<compile_context>
chip_gen: v7x
topology: tpu7x:2x2x1
jax: 0.10.0
libtpu: 0.0.40
codegen_flags: <defaults>
</compile_context>

<pallas_src>
import functools

import jax
import jax.numpy as jnp
from jax import lax
from jax.experimental import pallas as pl
from jax.experimental.pallas import tpu as pltpu

LANE = 128  # TPU lane width; packed slab / output / hidden last dim


def _round8(x):
    return ((x + 7) // 8) * 8


def _layout(S):
    """Row offsets of each parameter inside the packed [rows, 128] slab."""
    r_w1 = 0                      # [S, 128]    first linear weight   (cols 0:H valid)
    r_w2 = r_w1 + _round8(S)      # [128, 128]  second linear weight  (0:H x 0:H valid)
    r_wh = r_w2 + LANE            # [128, 128]  fused head weight     (wa | wv | 0)
    r_b1 = r_wh + LANE            # [1, 128]    first bias
    r_b2 = r_b1 + 8               # [1, 128]    second bias
    r_bh = r_b2 + 8               # [1, 128]    fused head bias       (ba | bv | 0)
    rows = r_bh + 8
    return r_w1, r_w2, r_wh, r_b1, r_b2, r_bh, rows


def _ppo_policy_kernel(state_ref, params_ref, out_ref, *, S, A):
    r_w1, r_w2, r_wh, r_b1, r_b2, r_bh, _ = _layout(S)

    x = state_ref[...]                                    # [bt, S]

    # Static, full-lane-width slices of the resident parameter slab.
    w1 = params_ref[r_w1:r_w1 + S, :]                     # [S, 128]
    w2 = params_ref[r_w2:r_w2 + LANE, :]                  # [128, 128]
    wh = params_ref[r_wh:r_wh + LANE, :]                  # [128, 128]
    b1 = params_ref[r_b1:r_b1 + 1, :]                     # [1, 128]
    b2 = params_ref[r_b2:r_b2 + 1, :]                     # [1, 128]
    bh = params_ref[r_bh:r_bh + 1, :]                     # [1, 128]

    # shared_layers: Linear -> ReLU -> Linear -> ReLU (all lane-dense [bt, 128];
    # lanes H:128 are exactly zero because the padded weight cols / bias lanes are zero).
    h1 = jnp.maximum(jnp.dot(x, w1, preferred_element_type=jnp.float32) + b1, 0.0)
    h2 = jnp.maximum(jnp.dot(h1, w2, preferred_element_type=jnp.float32) + b2, 0.0)

    # Fused action + value heads: one lane-dense MXU matmul -> [bt, 128]
    head = jnp.dot(h2, wh, preferred_element_type=jnp.float32) + bh

    bt = head.shape[0]
    col = lax.broadcasted_iota(jnp.int32, (bt, LANE), 1)
    is_logit = col < A                                    # action-logit lanes
    is_value = col == A                                   # value lane

    # Numerically stable softmax over the first A lanes (padding lanes -> 0 via exp(-inf)).
    masked = jnp.where(is_logit, head, -jnp.inf)
    m = jnp.max(masked, axis=-1, keepdims=True)
    e = jnp.exp(masked - m)
    probs = e * pl.reciprocal(jnp.sum(e, axis=-1, keepdims=True), approx=False)

    # Lane-dense packed output: [ probs (A) | value (1) | zeros ].
    out_ref[...] = jnp.where(is_logit, probs, jnp.where(is_value, head, 0.0))


def pack_params(params, state_size, hidden_size, action_size):
    """Pack w1/b1/w2/b2/wa/ba/wv/bv into one lane-dense f32 [rows, 128] slab.

    All weights are stored at full 128-lane width (zero-padded), so the kernel
    never takes lane sub-slices and every intermediate is lane-dense."""
    S, H, A = state_size, hidden_size, action_size
    assert H <= LANE and A + 1 <= LANE, "hidden/action dims must fit one lane tile"
    r_w1, r_w2, r_wh, r_b1, r_b2, r_bh, rows = _layout(S)

    slab = jnp.zeros((rows, LANE), jnp.float32)
    slab = slab.at[r_w1:r_w1 + S, 0:H].set(params["w1"])
    slab = slab.at[r_w2:r_w2 + H, 0:H].set(params["w2"])
    slab = slab.at[r_wh:r_wh + H, 0:A].set(params["wa"])
    slab = slab.at[r_wh:r_wh + H, A:A + 1].set(params["wv"])
    slab = slab.at[r_b1, 0:H].set(params["b1"][0])
    slab = slab.at[r_b2, 0:H].set(params["b2"][0])
    slab = slab.at[r_bh, 0:A].set(params["ba"][0])
    slab = slab.at[r_bh, A].set(params["bv"][0, 0])
    return slab


def ppo_policy_forward(state, param_slab, *, action_size, block_batch=512):
    """state: [B, S] f32; param_slab from pack_params.

    Returns (action_probs [B, A], state_values [B, 1])."""
    B, S = state.shape
    A = action_size
    rows = param_slab.shape[0]

    # Batch tile: multiple of 8 sublanes, up to `block_batch` rows per grid step.
    bt = min(block_batch, _round8(B))
    bt = _round8(bt)
    b_pad = pl.cdiv(B, bt) * bt
    if b_pad != B:
        state = jnp.pad(state, ((0, b_pad - B), (0, 0)))
    n_blocks = b_pad // bt

    kernel = functools.partial(_ppo_policy_kernel, S=S, A=A)
    cost = pl.CostEstimate(
        flops=2 * b_pad * (S * LANE + LANE * LANE + LANE * LANE),
        transcendentals=b_pad * LANE,
        bytes_accessed=4 * (b_pad * S + rows * LANE + b_pad * LANE),
    )

    out = pl.pallas_call(
        kernel,
        out_shape=jax.ShapeDtypeStruct((b_pad, LANE), jnp.float32),
        grid=(n_blocks,),
        in_specs=[
            pl.BlockSpec((bt, S), lambda i: (i, 0)),
            # Same block every step -> the slab is DMA'd once and stays resident.
            pl.BlockSpec((rows, LANE), lambda i: (0, 0)),
        ],
        out_specs=pl.BlockSpec((bt, LANE), lambda i: (i, 0)),
        compiler_params=pltpu.CompilerParams(
            dimension_semantics=("parallel",)),
        cost_estimate=cost,
    )(state, param_slab)

    action_probs = out[:B, :A]
    state_values = out[:B, A:A + 1]
    return action_probs, state_values


def init_params(key, state_size, action_size, hidden_size):
    """Deterministic init mirroring nn.Linear default (uniform +/- 1/sqrt(fan_in))."""
    def linear(k, fan_in, fan_out):
        kw, kb = jax.random.split(k)
        bound = 1.0 / jnp.sqrt(fan_in)
        w = jax.random.uniform(kw, (fan_in, fan_out), jnp.float32, -bound, bound)
        b = jax.random.uniform(kb, (1, fan_out), jnp.float32, -bound, bound)
        return w, b

    k1, k2, k3, k4 = jax.random.split(key, 4)
    w1, b1 = linear(k1, state_size, hidden_size)
    w2, b2 = linear(k2, hidden_size, hidden_size)
    wa, ba = linear(k3, hidden_size, action_size)
    wv, bv = linear(k4, hidden_size, 1)
    return {"w1": w1, "b1": b1, "w2": w2, "b2": b2,
            "wa": wa, "ba": ba, "wv": wv, "bv": bv}


def _reference(state, p):
    h1 = jnp.maximum(state @ p["w1"] + p["b1"], 0.0)
    h2 = jnp.maximum(h1 @ p["w2"] + p["b2"], 0.0)
    probs = jax.nn.softmax(h2 @ p["wa"] + p["ba"], axis=-1)
    value = h2 @ p["wv"] + p["bv"]
    return probs, value


if __name__ == "__main__":
    STATE, ACTION, HIDDEN = 8, 6, 32
    # TODO(synk): hidden_size > 128 (e.g. the PyTorch default 256) needs a second
    # lane tile per hidden layer; this kernel asserts H <= 128.

    key = jax.random.PRNGKey(0)
    k_state, k_params, k_big = jax.random.split(key, 3)
    params = init_params(k_params, STATE, ACTION, HIDDEN)

    # Pack parameters once (outside the per-call hot path).
    param_slab = pack_params(params, STATE, HIDDEN, ACTION)

    # --- small batch (B=4, padded to 8 sublanes inside the wrapper) ---
    B = 4
    state = jax.random.normal(k_state, (B, STATE), jnp.float32)
    probs, values = ppo_policy_forward(state, param_slab, action_size=ACTION)
    probs, values = jax.block_until_ready((probs, values))

    ref_probs, ref_values = _reference(state, params)
    assert probs.shape == (B, ACTION) and values.shape == (B, 1)
    assert jnp.allclose(probs, ref_probs, atol=1e-5, rtol=1e-5)
    assert jnp.allclose(values, ref_values, atol=1e-5, rtol=1e-5)
    assert jnp.allclose(jnp.sum(probs, axis=-1), 1.0, atol=1e-5)

    # --- large / ragged batch (exercises the grid, resident slab, padding) ---
    BIG = 1000
    big_state = jax.random.normal(k_big, (BIG, STATE), jnp.float32)
    big_probs, big_values = ppo_policy_forward(big_state, param_slab, action_size=ACTION)
    big_probs, big_values = jax.block_until_ready((big_probs, big_values))

    ref_bp, ref_bv = _reference(big_state, params)
    assert big_probs.shape == (BIG, ACTION) and big_values.shape == (BIG, 1)
    assert jnp.allclose(big_probs, ref_bp, atol=1e-5, rtol=1e-5)
    assert jnp.allclose(big_values, ref_bv, atol=1e-5, rtol=1e-5)
    assert jnp.allclose(jnp.sum(big_probs, axis=-1), 1.0, atol=1e-5)

    print("KERNEL_OK")
</pallas_src>

<mosaic_0001>
module attributes {stable_mosaic.version = 11 : i64} {
  func.func @_ppo_policy_kernel(%arg0: i32, %arg1: memref<8x8xf32, #tpu.memory_space<vmem>>, %arg2: memref<288x128xf32, #tpu.memory_space<vmem>>, %arg3: memref<8x128xf32, #tpu.memory_space<vmem>>) attributes {dimension_semantics = [#tpu.dimension_semantics<parallel>], iteration_bounds = array<i64: 1>, scalar_prefetch = 0 : i64, scratch_operands = 0 : i64, tpu.core_type = #tpu.core_type<tc>, window_params = [{transform_indices = @transform_0, window_bounds = array<i64: 8, 8>}, {pipeline_mode = #tpu.pipeline_mode<synchronous>, transform_indices = @transform_1, window_bounds = array<i64: 288, 128>}, {transform_indices = @transform_2, window_bounds = array<i64: 8, 128>}]} {
    %c0 = arith.constant 0 : index
    %c0_0 = arith.constant 0 : index
    %0 = vector.load %arg1[%c0, %c0_0] : memref<8x8xf32, #tpu.memory_space<vmem>>, vector<8x8xf32>
    %c0_1 = arith.constant 0 : index
    %c0_2 = arith.constant 0 : index
    %1 = vector.load %arg2[%c0_1, %c0_2] : memref<288x128xf32, #tpu.memory_space<vmem>>, vector<8x128xf32>
    %c8 = arith.constant 8 : index
    %c0_3 = arith.constant 0 : index
    %2 = vector.load %arg2[%c8, %c0_3] : memref<288x128xf32, #tpu.memory_space<vmem>>, vector<128x128xf32>
    %c136 = arith.constant 136 : index
    %c0_4 = arith.constant 0 : index
    %3 = vector.load %arg2[%c136, %c0_4] : memref<288x128xf32, #tpu.memory_space<vmem>>, vector<128x128xf32>
    %c264 = arith.constant 264 : index
    %c0_5 = arith.constant 0 : index
    %4 = vector.load %arg2[%c264, %c0_5] : memref<288x128xf32, #tpu.memory_space<vmem>>, vector<1x128xf32>
    %c272 = arith.constant 272 : index
    %c0_6 = arith.constant 0 : index
    %5 = vector.load %arg2[%c272, %c0_6] : memref<288x128xf32, #tpu.memory_space<vmem>>, vector<1x128xf32>
    %c280 = arith.constant 280 : index
    %c0_7 = arith.constant 0 : index
    %6 = vector.load %arg2[%c280, %c0_7] : memref<288x128xf32, #tpu.memory_space<vmem>>, vector<1x128xf32>
    %cst = arith.constant dense<0.000000e+00> : vector<8x128xf32>
    %7 = tpu.matmul %0, %1, %cst {dimension_numbers = #tpu.dot_dimension_numbers<[1], [0], [0], [1], [0, 0, 1, 1], [], []>} : vector<8x8xf32>, vector<8x128xf32>, vector<8x128xf32> -> vector<8x128xf32>
    %8 = vector.broadcast %4 : vector<1x128xf32> to vector<8x128xf32>
    %9 = arith.addf %7, %8 : vector<8x128xf32>
    %cst_8 = arith.constant 0.000000e+00 : f32
    %10 = vector.broadcast %cst_8 : f32 to vector<8x128xf32>
    %11 = arith.maximumf %9, %10 : vector<8x128xf32>
    %cst_9 = arith.constant dense<0.000000e+00> : vector<8x128xf32>
    %12 = tpu.matmul %11, %2, %cst_9 {dimension_numbers = #tpu.dot_dimension_numbers<[1], [0], [0], [1], [0, 0, 1, 1], [], []>} : vector<8x128xf32>, vector<128x128xf32>, vector<8x128xf32> -> vector<8x128xf32>
    %13 = vector.broadcast %5 : vector<1x128xf32> to vector<8x128xf32>
    %14 = arith.addf %12, %13 : vector<8x128xf32>
    %cst_10 = arith.constant 0.000000e+00 : f32
    %15 = vector.broadcast %cst_10 : f32 to vector<8x128xf32>
    %16 = arith.maximumf %14, %15 : vector<8x128xf32>
    %cst_11 = arith.constant dense<0.000000e+00> : vector<8x128xf32>
    %17 = tpu.matmul %16, %3, %cst_11 {dimension_numbers = #tpu.dot_dimension_numbers<[1], [0], [0], [1], [0, 0, 1, 1], [], []>} : vector<8x128xf32>, vector<128x128xf32>, vector<8x128xf32> -> vector<8x128xf32>
    %18 = vector.broadcast %6 : vector<1x128xf32> to vector<8x128xf32>
    %19 = arith.addf %17, %18 : vector<8x128xf32>
    %20 = tpu.iota {dimensions = array<i32: 1>} : vector<8x128xi32>
    %c6_i32 = arith.constant 6 : i32
    %21 = vector.broadcast %c6_i32 : i32 to vector<8x128xi32>
    %22 = arith.cmpi slt, %20, %21 : vector<8x128xi32>
    %c6_i32_12 = arith.constant 6 : i32
    %23 = vector.broadcast %c6_i32_12 : i32 to vector<8x128xi32>
    %24 = arith.cmpi eq, %20, %23 : vector<8x128xi32>
    %cst_13 = arith.constant 0xFF800000 : f32
    %25 = vector.broadcast %cst_13 : f32 to vector<8x128xf32>
    %26 = arith.select %22, %19, %25 : vector<8x128xi1>, vector<8x128xf32>
    %cst_14 = arith.constant dense<0xFF800000> : vector<8xf32>
    %27 = vector.multi_reduction <maximumf>, %26, %cst_14 [1] : vector<8x128xf32> to vector<8xf32>
    %28 = vector.shape_cast %27 : vector<8xf32> to vector<8x1xf32>
    %29 = vector.broadcast %28 : vector<8x1xf32> to vector<8x128xf32>
    %30 = arith.subf %26, %29 : vector<8x128xf32>
    %31 = math.exp %30 : vector<8x128xf32>
    %cst_15 = arith.constant dense<0.000000e+00> : vector<8xf32>
    %32 = vector.multi_reduction <add>, %31, %cst_15 [1] : vector<8x128xf32> to vector<8xf32>
    %33 = vector.shape_cast %32 : vector<8xf32> to vector<8x1xf32>
    %34 = tpu.reciprocal %33 : vector<8x1xf32> -> vector<8x1xf32>
    %35 = vector.broadcast %34 : vector<8x1xf32> to vector<8x128xf32>
    %36 = arith.mulf %31, %35 : vector<8x128xf32>
    %cst_16 = arith.constant 0.000000e+00 : f32
    %37 = vector.broadcast %cst_16 : f32 to vector<8x128xf32>
    %38 = arith.select %24, %19, %37 : vector<8x128xi1>, vector<8x128xf32>
    %39 = arith.select %22, %36, %38 : vector<8x128xi1>, vector<8x128xf32>
    %c0_17 = arith.constant 0 : index
    %c0_18 = arith.constant 0 : index
    %40 = vector.load %arg3[%c0_17, %c0_18] : memref<8x128xf32, #tpu.memory_space<vmem>>, vector<8x128xf32>
    tpu.vector_store %arg3[%c0_17, %c0_18], %39 {strides = array<i32>} : memref<8x128xf32, #tpu.memory_space<vmem>>, vector<8x128xf32>,
    return
  }
  func.func @transform_0(%arg0: i32) -> (i32, i32) {
    %c0_i32 = arith.constant 0 : i32
    %c0_i32_0 = arith.constant 0 : i32
    return %arg0, %c0_i32 : i32, i32
  }
  func.func @transform_1(%arg0: i32) -> (i32, i32) {
    %c0_i32 = arith.constant 0 : i32
    %c0_i32_0 = arith.constant 0 : i32
    %c0_i32_1 = arith.constant 0 : i32
    return %c0_i32, %c0_i32_0 : i32, i32
  }
  func.func @transform_2(%arg0: i32) -> (i32, i32) {
    %c0_i32 = arith.constant 0 : i32
    %c0_i32_0 = arith.constant 0 : i32
    return %arg0, %c0_i32 : i32, i32
  }
}

</mosaic_0001>

<bundles_post_ra>
// kernel: tpu_custom_call.1
= control target key start
LH: loop header
LB: loop body
LE: loop exit
PB: predicated region body
PF: predicated region fallthrough
CT: control target
= control target key end

     0   :  { %7 = vsyncpa [#allocation3], 0  ;;  %s670_s0 = inlined_call_operand.hbm [shape: f32[8,8], index: 0, kind: input, shape index: {}]   ;;  %s671_s1 = inlined_call_operand.hbm [shape: f32[288,128], index: 1, kind: input, shape index: {}]   ;;  %s672_s2 = inlined_call_operand.hbm [shape: f32[8,128], index: 2, kind: output, shape index: {}]  }
   0x1   :  { %8 = vsyncpa [#allocation6], 0 }
   0x2   :  { %9 = vsyncpa [#allocation4], 0  ;;  %s583_s9 = smov [#allocation2]   ;;  %s584_s11 = smov [#allocation5]  }
   0x3   :  { %s16_s10 = sshll.u32 %s583_s9, 4  ;;  %s25_s12 = sshll.u32 %s584_s11, 4  ;;  %s17_s10 = int_to_ptr.vmem [resolvable:$true] %s16_s10  ;;  %s606_s12 = int_to_ptr.vmem [resolvable:$true] %s25_s12 }
   0x4   :  { %s511_s15 = scalar_lea.hbm %s670_s0, 128 }
   0x5   :  { %p512_p0 = scmp.ne.s32.totalorder %s670_s0, %s511_s15  ;;  %p515_p1 = scmp.lt.u32.totalorder %s511_s15, %s670_s0 }
   0x7   :  { %p517_p2 = pnand %p515_p1, %p512_p0 }
   0x9   :  { %520 = shalt.err (!%p517_p2)
}
   0xa   :  { %s521_s20 = scalar_lea.vmem %s17_s10, 128  ;;  %p526_p4 = scmp.lt.s32.totalorder %s17_s10, %s17_s10 }
   0xb   :  { %p522_p3 = scmp.ne.s32.totalorder %s17_s10, %s521_s20  ;;  %p527_p5 = scmp.lt.s32.totalorder %s521_s20, %s521_s20 }
   0xd   :  { %p528_p6 = por %p527_p5, %p526_p4 }
   0xf   :  { %p529_p7 = pnand %p528_p6, %p522_p3 }
  0x11   :  { %532 = shalt.err (!%p529_p7)
}
  0x12   :  { %19 = dma.hbm_to_vmem [thread:$0]  %s670_s0, 128, %s17_s10, [#allocation3]  }
  0x13   :  { %s533_s25 = scalar_lea.hbm %s671_s1, 4608 }
  0x14   :  { %p534_p8 = scmp.ne.s32.totalorder %s671_s1, %s533_s25  ;;  %p537_p9 = scmp.lt.u32.totalorder %s533_s25, %s671_s1 }
  0x16   :  { %p539_p10 = pnand %p537_p9, %p534_p8 }
  0x18   :  { %542 = shalt.err (!%p539_p10)
}
  0x19   :  { %s543_s30 = scalar_lea.vmem %s606_s12, 4608  ;;  %p548_p12 = scmp.lt.s32.totalorder %s606_s12, %s606_s12 }
  0x1a   :  { %p544_p11 = scmp.ne.s32.totalorder %s606_s12, %s543_s30  ;;  %p549_p13 = scmp.lt.s32.totalorder %s543_s30, %s543_s30 }
  0x1c   :  { %p550_p0 = por %p549_p13, %p548_p12 }
  0x1e   :  { %p551_p1 = pnand %p550_p0, %p544_p11 }
  0x20   :  { %554 = shalt.err (!%p551_p1)
}
  0x21   :  { %s585_s0 = smov 128   ;;  %s586_s3 = smov 8  }
  0x22   :  { %31 = dma.hbm_to_vmem [thread:$0]  %s671_s1, 4608, %s606_s12, [#allocation6], %s585_s0, %s585_s0, %s586_s3  }
  0x23   :  { %577 = dma.done.wait [#allocation3], 128  }
  0x24   :  { %578 = vsyncadd [#allocation3], 4294967168 }
  0x25   :  { %579 = dma.done.wait [#allocation6], 4608  }
  0x26   :  { %580 = vsyncadd [#allocation6], 4294962688  ;;  %v587_v0 = vmov 0.0   ;;  %vm588_vm0 = vmmov 0   ;;  %v589_v1 = vmov 0.0|0.0   ;;  %vm79_vm1 = vcmask 64512  }
  0x27   :  { %376 = vmatprep.subr.mxu0 %v587_v0  ;;  %378 = vmatprep.mubr.msk.f32.mxu0 %vm588_vm0, %v587_v0  ;;  %v39_v2 = vld [vmem:[#allocation5] sm:$0xff]  ;;  %v38_v3 = vld [vmem:[#allocation2] sm:$0xff]  ;;  %v40_v4 = vld [vmem:[#allocation5 + $0x8] sm:$0xff]  ;;  %v303_v62 = vlaneseq  ;;  %s590_s1 = smov [#allocation7]  }
  0x28   :  { %451 = vmatprep.subr.bf16.mxu1 %v589_v1  ;;  %413 = vmatprep.mubr.msk.f32.mxu1 %vm588_vm0, %v587_v0  ;;  %v41_v5 = vld [vmem:[#allocation5 + $0x10] sm:$0xff]  ;;  %v42_v6 = vld [vmem:[#allocation5 + $0x18] sm:$0xff]  ;;  %v43_v7 = vld [vmem:[#allocation5 + $0x20] sm:$0xff]  ;;  %s326_s6 = sshll.u32 %s590_s1, 4  ;;  %s327_s6 = int_to_ptr.vmem [resolvable:$true] %s326_s6 }
  0x29   :  { %377 = vmatpush3.msra.mxu0 %v39_v2  ;;  %v452_v8 = vpack.c.bf16 %v41_v5, %v40_v4  ;;  %v455_v9 = vpack.c.bf16 %v43_v7, %v42_v6  ;;  %v44_v10 = vld [vmem:[#allocation5 + $0x28] sm:$0xff]  ;;  %v45_v11 = vld [vmem:[#allocation5 + $0x30] sm:$0xff]  ;;  %v46_v13 = vld [vmem:[#allocation5 + $0x38] sm:$0xff]  ;;  %v304_v63 = vand.u32 127, %v303_v62  ;;  %s555_s7 = scalar_lea.vmem %s327_s6, 128  ;;  %p560_p3 = scmp.lt.s32.totalorder %s327_s6, %s327_s6 }
  0x2a   :  { %379 = vmatmul.mubr.msk.f32.vlgmr.msra.gmra.mrb[0].mxu0 %vm79_vm1, %v38_v3  ;;  %475 = vmatprep.subr.bf16.mxu0 %v589_v1  ;;  %v458_v12 = vpack.c.bf16 %v45_v11, %v44_v10  ;;  %v47_v14 = vld [vmem:[#allocation5 + $0x40] sm:$0xff]  ;;  %v48_v16 = vld [vmem:[#allocation5 + $0x48] sm:$0xff]  ;;  %v49_v17 = vld [vmem:[#allocation5 + $0x50] sm:$0xff]  ;;  %p556_p2 = scmp.ne.s32.totalorder %s327_s6, %s555_s7  ;;  %p561_p4 = scmp.lt.s32.totalorder %s555_s7, %s555_s7 }
  0x2b   :  { %448 = vmatprep.mubr.msk.f32.mxu0 %vm588_vm0, %v587_v0  ;;  %453 = vmatpush3.bf16.msra.mxu1 %v452_v8  ;;  %v461_v15 = vpack.c.bf16 %v47_v14, %v46_v13  ;;  %v464_v18 = vpack.c.bf16 %v49_v17, %v48_v16  ;;  %v50_v19 = vld [vmem:[#allocation5 + $0x58] sm:$0xff]  ;;  %v51_v20 = vld [vmem:[#allocation5 + $0x60] sm:$0xff]  ;;  %v52_v22 = vld [vmem:[#allocation5 + $0x68] sm:$0xff]  ;;  %vm306_vm2 = vcmp.eq.s32.totalorder %v304_v63, 6  ;;  %vm305_vm3 = vcmp.lt.s32.totalorder %v304_v63, 6 }
  0x2c   :  { %454 = vmatprep.subr.bf16.mxu1 %v589_v1  ;;  %v467_v21 = vpack.c.bf16 %v51_v20, %v50_v19  ;;  %v53_v23 = vld [vmem:[#allocation5 + $0x70] sm:$0xff]  ;;  %v54_v25 = vld [vmem:[#allocation5 + $0x78] sm:$0xff]  ;;  %v55_v26 = vld [vmem:[#allocation5 + $0x80] sm:$0xff]  ;;  %p562_p5 = por %p561_p4, %p560_p3 }
  0x2d   :  { %v470_v24 = vpack.c.bf16 %v53_v23, %v52_v22  ;;  %v473_v27 = vpack.c.bf16 %v55_v26, %v54_v25  ;;  %v56_v28 = vld [vmem:[#allocation5 + $0x88] sm:$0xff]  ;;  %v57_v29 = vld [vmem:[#allocation5 + $0x90] sm:$0xff]  ;;  %v58_v30 = vld [vmem:[#allocation5 + $0x98] sm:$0xff] }
  0x2e   :  { %v476_v31 = vpack.c.bf16 %v57_v29, %v56_v28  ;;  %v59_v32 = vld [vmem:[#allocation5 + $0xa0] sm:$0xff]  ;;  %v60_v34 = vld [vmem:[#allocation5 + $0xa8] sm:$0xff]  ;;  %v61_v35 = vld [vmem:[#allocation5 + $0xb0] sm:$0xff]  ;;  %p563_p6 = pnand %p562_p5, %p556_p2 }
  0x2f   :  { %456 = vmatpush3.bf16.msra.mxu1 %v455_v9  ;;  %v479_v33 = vpack.c.bf16 %v59_v32, %v58_v30  ;;  %v482_v36 = vpack.c.bf16 %v61_v35, %v60_v34  ;;  %v62_v37 = vld [vmem:[#allocation5 + $0xb8] sm:$0xff]  ;;  %v63_v38 = vld [vmem:[#allocation5 + $0xc0] sm:$0xff]  ;;  %v64_v40 = vld [vmem:[#allocation5 + $0xc8] sm:$0xff] }
  0x30   :  { %457 = vmatprep.subr.bf16.mxu1 %v589_v1  ;;  %477 = vmatpush3.bf16.msra.mxu0 %v476_v31  ;;  %v485_v39 = vpack.c.bf16 %v63_v38, %v62_v37  ;;  %v65_v41 = vld [vmem:[#allocation5 + $0xd0] sm:$0xff]  ;;  %v66_v43 = vld [vmem:[#allocation5 + $0xd8] sm:$0xff]  ;;  %v67_v44 = vld [vmem:[#allocation5 + $0xe0] sm:$0xff] }
  0x31   :  { %478 = vmatprep.subr.bf16.mxu0 %v589_v1  ;;  %v488_v42 = vpack.c.bf16 %v65_v41, %v64_v40  ;;  %v491_v45 = vpack.c.bf16 %v67_v44, %v66_v43  ;;  %v68_v46 = vld [vmem:[#allocation5 + $0xe8] sm:$0xff]  ;;  %v69_v47 = vld [vmem:[#allocation5 + $0xf0] sm:$0xff]  ;;  %v70_v54 = vld [vmem:[#allocation5 + $0xf8] sm:$0xff] }
  0x32   :  { %v494_v48 = vpack.c.bf16 %v69_v47, %v68_v46  ;;  %v336_v49 = vld [vmem:[#allocation5 + $0x108] ss:$0 sm:$0xff]  ;;  %v71_v55 = vld [vmem:[#allocation5 + $0x100] sm:$0xff]  ;;  %v338_v57 = vld [vmem:[#allocation5 + $0x110] ss:$0 sm:$0xff] }
  0x33   :  { %459 = vmatpush3.bf16.msra.mxu1 %v458_v12  ;;  %v497_v56 = vpack.c.bf16 %v71_v55, %v70_v54  ;;  %v339_v0 = vld [vmem:[#allocation5 + $0x118] ss:$0 sm:$0xff] }
  0x34   :  { %460 = vmatprep.subr.bf16.mxu1 %v589_v1  ;;  %480 = vmatpush3.bf16.msra.mxu0 %v479_v33 }
  0x35   :  { %481 = vmatprep.subr.bf16.mxu0 %v589_v1 }
  0x37   :  { %462 = vmatpush3.bf16.msra.mxu1 %v461_v15 }
  0x38   :  { %463 = vmatprep.subr.bf16.mxu1 %v589_v1  ;;  %483 = vmatpush3.bf16.msra.mxu0 %v482_v36 }
  0x39   :  { %484 = vmatprep.subr.bf16.mxu0 %v589_v1 }
  0x3b   :  { %465 = vmatpush3.bf16.msra.mxu1 %v464_v18 }
  0x3c   :  { %466 = vmatprep.subr.bf16.mxu1 %v589_v1  ;;  %486 = vmatpush3.bf16.msra.mxu0 %v485_v39 }
  0x3d   :  { %487 = vmatprep.subr.bf16.mxu0 %v589_v1 }
  0x3f   :  { %468 = vmatpush3.bf16.msra.mxu1 %v467_v21 }
  0x40   :  { %469 = vmatprep.subr.bf16.mxu1 %v589_v1  ;;  %489 = vmatpush3.bf16.msra.mxu0 %v488_v42 }
  0x41   :  { %490 = vmatprep.subr.bf16.mxu0 %v589_v1 }
  0x43   :  { %471 = vmatpush3.bf16.msra.mxu1 %v470_v24 }
  0x44   :  { %472 = vmatprep.subr.bf16.mxu1 %v589_v1  ;;  %492 = vmatpush3.bf16.msra.mxu0 %v491_v45 }
  0x45   :  { %493 = vmatprep.subr.bf16.mxu0 %v589_v1 }
  0x47   :  { %474 = vmatpush3.bf16.msra.mxu1 %v473_v27 }
  0x48   :  { %495 = vmatpush3.bf16.msra.mxu0 %v494_v48 }
  0x49   :  { %496 = vmatprep.subr.bf16.mxu0 %v589_v1 }
  0x4c   :  { %498 = vmatpush3.bf16.msra.mxu0 %v497_v56 }
  0xfd   :  { %v149_v50 = vpop.f32.mrb[0].mxu0 }
  0xfe   :  { %v150_v51 = vadd.f32 %v336_v49, %v149_v50  ;;  %v380_v52 = vpop.f32.mrb[1].mxu0 }
 0x100   :  { %v153_v53 = vmax.f32 %v150_v51, 0.0 }
 0x102   :  { %414 = vmatmul.mubr.f32.vlgmr.msra.gmra.mrb[0].mxu1 %v153_v53 }
 0x1d5   :  { %v224_v58 = vpop.f32.mrb[0].mxu1 }
 0x1d6   :  { %v225_v59 = vadd.f32 %v338_v57, %v224_v58  ;;  %v415_v60 = vpop.f32.mrb[1].mxu1 }
 0x1d8   :  { %v228_v61 = vmax.f32 %v225_v59, 0.0 }
 0x1da   :  { %449 = vmatmul.mubr.f32.vlgmr.msra.gmra.mrb[2].mxu0 %v228_v61 }
 0x2ad   :  { %v299_v1 = vpop.f32.mrb[2].mxu0 }
 0x2ae   :  { %v300_v2 = vadd.f32 %v339_v0, %v299_v1  ;;  %v450_v3 = vpop.f32.mrb[3].mxu0 }
 0x2b0   :  { %v317_v4 = vsel %vm306_vm2, %v300_v2, 0.0  ;;  %v307_v5 = vsel %vm305_vm3, %v300_v2, -inf }
 0x2b1   :  { %308 = vmax.xlane.f32.xlu0 %v307_v5 }
 0x33e   :  { %v309_v6 = vpop.xlane.xlu0 %308 }
 0x33f   :  { %v310_v7 = vsub.f32 %v307_v5, %v309_v6 }
 0x341   :  { %v311_v8 = vmul.f32 1.442695, %v310_v7 }
 0x343   :  { %507 = vpow2.f32 %v311_v8 }
 0x34d   :  { %v508_v9 = vpop.eup %507 }
 0x34e   :  { %313 = vadd.xlane.f32.xlu0 %v508_v9 }
 0x3db   :  { %v314_v10 = vpop.xlane.xlu0 %313 }
 0x3dc   :  { %509 = vrcp.f32 %v314_v10 }
 0x3e6   :  { %v510_v11 = vpop.eup %509 }
 0x3e7   :  { %v316_v12 = vmul.f32 %v510_v11, %v508_v9 }
 0x3e9   :  { %v318_v13 = vsel %vm305_vm3, %v316_v12, %v317_v4 }
 0x3ea   :  { %319 = vst [vmem:[#allocation7] sm:$0xff] %v318_v13 }
 0x3eb   :  { %566 = shalt.err (!%p563_p6)
}
 0x3ec   :  { %s567_s10 = scalar_lea.hbm %s672_s2, 128 }
 0x3ed   :  { %p568_p7 = scmp.ne.s32.totalorder %s672_s2, %s567_s10  ;;  %p571_p8 = scmp.lt.u32.totalorder %s567_s10, %s672_s2 }
 0x3ef   :  { %p573_p9 = pnand %p571_p8, %p568_p7 }
 0x3f1   :  { %576 = shalt.err (!%p573_p9)
}
 0x3f2   :  { %329 = dma.vmem_to_hbm [thread:$0]  %s327_s6, 128, %s672_s2, [#allocation4]  }
 0x3f3   :  { %581 = dma.done.wait [#allocation4], 128  }
 0x3f4   :  { %582 = vsyncadd [#allocation4], 4294967168 }
 0x3f5   :  { %333 = vsyncpa [#allocation3], 1 }
 0x3f6   :  { %334 = vsyncpa [#allocation6], 1 }
 0x3f7   :  { %335 = vsyncpa [#allocation4], 1 }

</bundles_post_ra>
